<compile_context>
chip_gen: v5e
topology: v5e:2x2
jax: 0.10.0
libtpu: 0.0.40
codegen_flags: <defaults>
</compile_context>

<pallas_src>
import functools

import jax
import jax.numpy as jnp
from jax import lax
from jax.experimental import pallas as pl
from jax.experimental.pallas import tpu as pltpu


def _round_up(x, m):
    return ((x + m - 1) // m) * m


def _pick_tile(dim, cap):
    """Largest multiple of 128 that divides `dim` and is <= cap (dim % 128 == 0)."""
    t = min(dim, cap)
    while dim % t:
        t -= 128
    return t


def _conv1x1_kernel(th, x_ref, w_ref, b_ref, o_ref, acc_ref):
    # x_ref  : (TH, 1, Wo, TK)   strided-subsampled input rows, channels-last
    # w_ref  : (TK, TN)          weight tile
    # b_ref  : (1, TN)           bias tile (f32)
    # o_ref  : (TH, Wo, TN)      output tile (lane-dense: TN % 128 == 0)
    # acc_ref: (TH, Wo, TN) f32  accumulator, resident across the K axis
    k = pl.program_id(2)

    @pl.when(k == 0)
    def _init():
        acc_ref[...] = jnp.zeros_like(acc_ref)

    w = w_ref[...]
    for t in range(th):  # static unroll; th <= 8
        acc_ref[t] += jnp.dot(x_ref[t, 0], w, preferred_element_type=jnp.float32)

    @pl.when(k == pl.num_programs(2) - 1)
    def _finalize():
        o_ref[...] = (acc_ref[...] + b_ref[...]).astype(o_ref.dtype)


def downsample_conv_nhwc(x, weight, bias, stride=1):
    """1x1 strided conv + bias, NHWC in / NHWC out (TPU-native path).

    x:      (N, H, W, Cin)
    weight: (Cout, Cin, 1, 1) or (Cout, Cin)   (PyTorch OIHW convention)
    bias:   (Cout,)
    """
    N, H, W, Cin = x.shape
    Cout = weight.shape[0]
    s = int(stride)

    Ho = -(-H // s)          # ceil(H / s) == floor((H-1)/s) + 1
    Wo = -(-W // s)
    Hp, Wp = Ho * s, Wo * s

    # Channel padding to hardware lanes.  Real ResNetV2 channel counts
    # (256..2048) are already multiples of 128, so these pads are no-ops there.
    Kp = _round_up(Cin, 128)
    Np = _round_up(Cout, 128)

    xd = x.dtype
    x_p = jnp.pad(x, ((0, 0), (0, Hp - H), (0, Wp - W), (0, Kp - Cin)))
    w_p = jnp.pad(weight.reshape(Cout, Cin).T.astype(xd),
                  ((0, Kp - Cin), (0, Np - Cout)))                   # (Kp, Np)
    b_p = jnp.pad(bias.astype(jnp.float32), (0, Np - Cout)).reshape(1, Np)

    # Free row-major view exposing the stride phases; phase 0 (i == 0, first Kp
    # columns) is exactly the strided subsample, selected via block offsets.
    G = N * Ho
    xv = x_p.reshape(G, s, Wo, s * Kp)

    TH = next(t for t in (8, 4, 2, 1) if G % t == 0)   # output rows per step
    TK = _pick_tile(Kp, 512)                           # contraction tile
    TN = _pick_tile(Np, 256)                           # output-channel tile
    grid = (G // TH, Np // TN, Kp // TK)

    kernel = functools.partial(_conv1x1_kernel, TH)

    flops = 2 * N * Ho * Wo * Cin * Cout
    bytes_accessed = (G * Wo * Kp + Kp * Np + G * Wo * Np) * x_p.dtype.itemsize

    out_v = pl.pallas_call(
        kernel,
        out_shape=jax.ShapeDtypeStruct((G, Wo, Np), xd),
        grid_spec=pltpu.PrefetchScalarGridSpec(
            num_scalar_prefetch=0,
            grid=grid,
            in_specs=[
                pl.BlockSpec((TH, 1, Wo, TK), lambda g, j, k: (g, 0, 0, k)),
                pl.BlockSpec((TK, TN), lambda g, j, k: (k, j)),
                pl.BlockSpec((1, TN), lambda g, j, k: (0, j)),
            ],
            out_specs=pl.BlockSpec((TH, Wo, TN), lambda g, j, k: (g, 0, j)),
            scratch_shapes=[pltpu.VMEM((TH, Wo, TN), jnp.float32)],
        ),
        compiler_params=pltpu.CompilerParams(
            dimension_semantics=("parallel", "parallel", "arbitrary"),
            vmem_limit_bytes=32 * 1024 * 1024,
        ),
        cost_estimate=pl.CostEstimate(
            flops=flops, transcendentals=0, bytes_accessed=bytes_accessed),
    )(xv, w_p, b_p)

    out = out_v.reshape(N, Ho, Wo, Np)
    if Np != Cout:
        out = out[..., :Cout]
    return out


def downsample_conv(x, weight, bias, stride=1):
    """PyTorch-layout adapter: NCHW in / NCHW out.

    In an end-to-end channels-last (NHWC) model these transposes disappear;
    the Pallas path itself is NHWC-native.
    """
    y = downsample_conv_nhwc(jnp.transpose(x, (0, 2, 3, 1)), weight, bias, stride)
    return jnp.transpose(y, (0, 3, 1, 2))


def _ref_conv_nchw(x, weight, bias, stride):
    y = lax.conv_general_dilated(
        x, weight, window_strides=(stride, stride), padding="VALID",
        dimension_numbers=("NCHW", "OIHW", "NCHW"))
    return y + bias.reshape(1, -1, 1, 1)


if __name__ == "__main__":
    key = jax.random.PRNGKey(0)

    def _check(N, Cin, H, W, Cout, stride, k):
        kx, kw, kb = jax.random.split(k, 3)
        x = jax.random.normal(kx, (N, Cin, H, W), dtype=jnp.float32)
        w = jax.random.normal(kw, (Cout, Cin, 1, 1), dtype=jnp.float32) * 0.1
        b = jax.random.normal(kb, (Cout,), dtype=jnp.float32) * 0.1
        y = jax.block_until_ready(downsample_conv(x, w, b, stride=stride))
        y_ref = _ref_conv_nchw(x, w, b, stride)
        assert y.shape == y_ref.shape, (y.shape, y_ref.shape)
        err = float(jnp.max(jnp.abs(y - y_ref)))
        assert jnp.allclose(y, y_ref, atol=1e-5, rtol=1e-5), err

    k1, k2, k3 = jax.random.split(key, 3)
    _check(2, 4, 16, 16, 8, 2, k1)   # main demo shape (stride-2 downsample)
    _check(1, 4, 15, 15, 8, 2, k2)   # odd spatial -> padded / non-divisible path
    _check(2, 4, 8, 8, 8, 1, k3)     # stride=1 path

    print("KERNEL_OK")
</pallas_src>

<mosaic_0001>
module attributes {stable_mosaic.version = 11 : i64} {
  func.func @_conv1x1_kernel(%arg0: i32, %arg1: i32, %arg2: i32, %arg3: memref<8x1x8x128xf32, #tpu.memory_space<vmem>>, %arg4: memref<128x128xf32, #tpu.memory_space<vmem>>, %arg5: memref<1x128xf32, #tpu.memory_space<vmem>>, %arg6: memref<8x8x128xf32, #tpu.memory_space<vmem>>, %arg7: memref<8x8x128xf32, #tpu.memory_space<vmem>>) attributes {dimension_semantics = [#tpu.dimension_semantics<parallel>, #tpu.dimension_semantics<parallel>, #tpu.dimension_semantics<arbitrary>], iteration_bounds = array<i64: 2, 1, 1>, scalar_prefetch = 0 : i64, scratch_operands = 1 : i64, tpu.core_type = #tpu.core_type<tc>, window_params = [{transform_indices = @transform_0, window_bounds = array<i64: 8, 1, 8, 128>}, {transform_indices = @transform_1, window_bounds = array<i64: 128, 128>}, {transform_indices = @transform_2, window_bounds = array<i64: 1, 128>}, {transform_indices = @transform_3, window_bounds = array<i64: 8, 8, 128>}]} {
    %c0_i32 = arith.constant 0 : i32
    %0 = arith.cmpi eq, %arg2, %c0_i32 : i32
    %1 = arith.extui %0 : i1 to i32
    %c0_i32_0 = arith.constant 0 : i32
    %2 = arith.cmpi ne, %1, %c0_i32_0 : i32
    scf.if %2 {
      %cst_84 = arith.constant 0.000000e+00 : f32
      %79 = vector.broadcast %cst_84 : f32 to vector<8x8x128xf32>
      %c0_85 = arith.constant 0 : index
      %c0_86 = arith.constant 0 : index
      %c0_87 = arith.constant 0 : index
      %80 = vector.load %arg7[%c0_85, %c0_86, %c0_87] : memref<8x8x128xf32, #tpu.memory_space<vmem>>, vector<8x8x128xf32>
      tpu.vector_store %arg7[%c0_85, %c0_86, %c0_87], %79 {strides = array<i32>} : memref<8x8x128xf32, #tpu.memory_space<vmem>>, vector<8x8x128xf32>,
    } else {
    }
    %c0 = arith.constant 0 : index
    %c0_1 = arith.constant 0 : index
    %3 = vector.load %arg4[%c0, %c0_1] : memref<128x128xf32, #tpu.memory_space<vmem>>, vector<128x128xf32>
    %c0_2 = arith.constant 0 : index
    %c0_3 = arith.constant 0 : index
    %c0_4 = arith.constant 0 : index
    %4 = vector.load %arg7[%c0_2, %c0_3, %c0_4] : memref<8x8x128xf32, #tpu.memory_space<vmem>>, vector<1x8x128xf32>
    %5 = vector.shape_cast %4 : vector<1x8x128xf32> to vector<8x128xf32>
    %c0_5 = arith.constant 0 : index
    %c0_6 = arith.constant 0 : index
    %c0_7 = arith.constant 0 : index
    %c0_8 = arith.constant 0 : index
    %6 = vector.load %arg3[%c0_5, %c0_6, %c0_7, %c0_8] : memref<8x1x8x128xf32, #tpu.memory_space<vmem>>, vector<1x1x8x128xf32>
    %7 = vector.shape_cast %6 : vector<1x1x8x128xf32> to vector<8x128xf32>
    %cst = arith.constant dense<0.000000e+00> : vector<8x128xf32>
    %8 = tpu.matmul %7, %3, %cst {dimension_numbers = #tpu.dot_dimension_numbers<[1], [0], [0], [1], [0, 0, 1, 1], [], []>} : vector<8x128xf32>, vector<128x128xf32>, vector<8x128xf32> -> vector<8x128xf32>
    %9 = arith.addf %5, %8 : vector<8x128xf32>
    %c0_9 = arith.constant 0 : index
    %c0_10 = arith.constant 0 : index
    %c0_11 = arith.constant 0 : index
    %10 = vector.load %arg7[%c0_9, %c0_10, %c0_11] : memref<8x8x128xf32, #tpu.memory_space<vmem>>, vector<1x8x128xf32>
    %11 = vector.shape_cast %10 : vector<1x8x128xf32> to vector<8x128xf32>
    %12 = vector.shape_cast %9 : vector<8x128xf32> to vector<1x8x128xf32>
    tpu.vector_store %arg7[%c0_9, %c0_10, %c0_11], %12 {strides = array<i32>} : memref<8x8x128xf32, #tpu.memory_space<vmem>>, vector<1x8x128xf32>,
    %c1 = arith.constant 1 : index
    %c0_12 = arith.constant 0 : index
    %c0_13 = arith.constant 0 : index
    %13 = vector.load %arg7[%c1, %c0_12, %c0_13] : memref<8x8x128xf32, #tpu.memory_space<vmem>>, vector<1x8x128xf32>
    %14 = vector.shape_cast %13 : vector<1x8x128xf32> to vector<8x128xf32>
    %c1_14 = arith.constant 1 : index
    %c0_15 = arith.constant 0 : index
    %c0_16 = arith.constant 0 : index
    %c0_17 = arith.constant 0 : index
    %15 = vector.load %arg3[%c1_14, %c0_15, %c0_16, %c0_17] : memref<8x1x8x128xf32, #tpu.memory_space<vmem>>, vector<1x1x8x128xf32>
    %16 = vector.shape_cast %15 : vector<1x1x8x128xf32> to vector<8x128xf32>
    %cst_18 = arith.constant dense<0.000000e+00> : vector<8x128xf32>
    %17 = tpu.matmul %16, %3, %cst_18 {dimension_numbers = #tpu.dot_dimension_numbers<[1], [0], [0], [1], [0, 0, 1, 1], [], []>} : vector<8x128xf32>, vector<128x128xf32>, vector<8x128xf32> -> vector<8x128xf32>
    %18 = arith.addf %14, %17 : vector<8x128xf32>
    %c1_19 = arith.constant 1 : index
    %c0_20 = arith.constant 0 : index
    %c0_21 = arith.constant 0 : index
    %19 = vector.load %arg7[%c1_19, %c0_20, %c0_21] : memref<8x8x128xf32, #tpu.memory_space<vmem>>, vector<1x8x128xf32>
    %20 = vector.shape_cast %19 : vector<1x8x128xf32> to vector<8x128xf32>
    %21 = vector.shape_cast %18 : vector<8x128xf32> to vector<1x8x128xf32>
    tpu.vector_store %arg7[%c1_19, %c0_20, %c0_21], %21 {strides = array<i32>} : memref<8x8x128xf32, #tpu.memory_space<vmem>>, vector<1x8x128xf32>,
    %c2 = arith.constant 2 : index
    %c0_22 = arith.constant 0 : index
    %c0_23 = arith.constant 0 : index
    %22 = vector.load %arg7[%c2, %c0_22, %c0_23] : memref<8x8x128xf32, #tpu.memory_space<vmem>>, vector<1x8x128xf32>
    %23 = vector.shape_cast %22 : vector<1x8x128xf32> to vector<8x128xf32>
    %c2_24 = arith.constant 2 : index
    %c0_25 = arith.constant 0 : index
    %c0_26 = arith.constant 0 : index
    %c0_27 = arith.constant 0 : index
    %24 = vector.load %arg3[%c2_24, %c0_25, %c0_26, %c0_27] : memref<8x1x8x128xf32, #tpu.memory_space<vmem>>, vector<1x1x8x128xf32>
    %25 = vector.shape_cast %24 : vector<1x1x8x128xf32> to vector<8x128xf32>
    %cst_28 = arith.constant dense<0.000000e+00> : vector<8x128xf32>
    %26 = tpu.matmul %25, %3, %cst_28 {dimension_numbers = #tpu.dot_dimension_numbers<[1], [0], [0], [1], [0, 0, 1, 1], [], []>} : vector<8x128xf32>, vector<128x128xf32>, vector<8x128xf32> -> vector<8x128xf32>
    %27 = arith.addf %23, %26 : vector<8x128xf32>
    %c2_29 = arith.constant 2 : index
    %c0_30 = arith.constant 0 : index
    %c0_31 = arith.constant 0 : index
    %28 = vector.load %arg7[%c2_29, %c0_30, %c0_31] : memref<8x8x128xf32, #tpu.memory_space<vmem>>, vector<1x8x128xf32>
    %29 = vector.shape_cast %28 : vector<1x8x128xf32> to vector<8x128xf32>
    %30 = vector.shape_cast %27 : vector<8x128xf32> to vector<1x8x128xf32>
    tpu.vector_store %arg7[%c2_29, %c0_30, %c0_31], %30 {strides = array<i32>} : memref<8x8x128xf32, #tpu.memory_space<vmem>>, vector<1x8x128xf32>,
    %c3 = arith.constant 3 : index
    %c0_32 = arith.constant 0 : index
    %c0_33 = arith.constant 0 : index
    %31 = vector.load %arg7[%c3, %c0_32, %c0_33] : memref<8x8x128xf32, #tpu.memory_space<vmem>>, vector<1x8x128xf32>
    %32 = vector.shape_cast %31 : vector<1x8x128xf32> to vector<8x128xf32>
    %c3_34 = arith.constant 3 : index
    %c0_35 = arith.constant 0 : index
    %c0_36 = arith.constant 0 : index
    %c0_37 = arith.constant 0 : index
    %33 = vector.load %arg3[%c3_34, %c0_35, %c0_36, %c0_37] : memref<8x1x8x128xf32, #tpu.memory_space<vmem>>, vector<1x1x8x128xf32>
    %34 = vector.shape_cast %33 : vector<1x1x8x128xf32> to vector<8x128xf32>
    %cst_38 = arith.constant dense<0.000000e+00> : vector<8x128xf32>
    %35 = tpu.matmul %34, %3, %cst_38 {dimension_numbers = #tpu.dot_dimension_numbers<[1], [0], [0], [1], [0, 0, 1, 1], [], []>} : vector<8x128xf32>, vector<128x128xf32>, vector<8x128xf32> -> vector<8x128xf32>
    %36 = arith.addf %32, %35 : vector<8x128xf32>
    %c3_39 = arith.constant 3 : index
    %c0_40 = arith.constant 0 : index
    %c0_41 = arith.constant 0 : index
    %37 = vector.load %arg7[%c3_39, %c0_40, %c0_41] : memref<8x8x128xf32, #tpu.memory_space<vmem>>, vector<1x8x128xf32>
    %38 = vector.shape_cast %37 : vector<1x8x128xf32> to vector<8x128xf32>
    %39 = vector.shape_cast %36 : vector<8x128xf32> to vector<1x8x128xf32>
    tpu.vector_store %arg7[%c3_39, %c0_40, %c0_41], %39 {strides = array<i32>} : memref<8x8x128xf32, #tpu.memory_space<vmem>>, vector<1x8x128xf32>,
    %c4 = arith.constant 4 : index
    %c0_42 = arith.constant 0 : index
    %c0_43 = arith.constant 0 : index
    %40 = vector.load %arg7[%c4, %c0_42, %c0_43] : memref<8x8x128xf32, #tpu.memory_space<vmem>>, vector<1x8x128xf32>
    %41 = vector.shape_cast %40 : vector<1x8x128xf32> to vector<8x128xf32>
    %c4_44 = arith.constant 4 : index
    %c0_45 = arith.constant 0 : index
    %c0_46 = arith.constant 0 : index
    %c0_47 = arith.constant 0 : index
    %42 = vector.load %arg3[%c4_44, %c0_45, %c0_46, %c0_47] : memref<8x1x8x128xf32, #tpu.memory_space<vmem>>, vector<1x1x8x128xf32>
    %43 = vector.shape_cast %42 : vector<1x1x8x128xf32> to vector<8x128xf32>
    %cst_48 = arith.constant dense<0.000000e+00> : vector<8x128xf32>
    %44 = tpu.matmul %43, %3, %cst_48 {dimension_numbers = #tpu.dot_dimension_numbers<[1], [0], [0], [1], [0, 0, 1, 1], [], []>} : vector<8x128xf32>, vector<128x128xf32>, vector<8x128xf32> -> vector<8x128xf32>
    %45 = arith.addf %41, %44 : vector<8x128xf32>
    %c4_49 = arith.constant 4 : index
    %c0_50 = arith.constant 0 : index
    %c0_51 = arith.constant 0 : index
    %46 = vector.load %arg7[%c4_49, %c0_50, %c0_51] : memref<8x8x128xf32, #tpu.memory_space<vmem>>, vector<1x8x128xf32>
    %47 = vector.shape_cast %46 : vector<1x8x128xf32> to vector<8x128xf32>
    %48 = vector.shape_cast %45 : vector<8x128xf32> to vector<1x8x128xf32>
    tpu.vector_store %arg7[%c4_49, %c0_50, %c0_51], %48 {strides = array<i32>} : memref<8x8x128xf32, #tpu.memory_space<vmem>>, vector<1x8x128xf32>,
    %c5 = arith.constant 5 : index
    %c0_52 = arith.constant 0 : index
    %c0_53 = arith.constant 0 : index
    %49 = vector.load %arg7[%c5, %c0_52, %c0_53] : memref<8x8x128xf32, #tpu.memory_space<vmem>>, vector<1x8x128xf32>
    %50 = vector.shape_cast %49 : vector<1x8x128xf32> to vector<8x128xf32>
    %c5_54 = arith.constant 5 : index
    %c0_55 = arith.constant 0 : index
    %c0_56 = arith.constant 0 : index
    %c0_57 = arith.constant 0 : index
    %51 = vector.load %arg3[%c5_54, %c0_55, %c0_56, %c0_57] : memref<8x1x8x128xf32, #tpu.memory_space<vmem>>, vector<1x1x8x128xf32>
    %52 = vector.shape_cast %51 : vector<1x1x8x128xf32> to vector<8x128xf32>
    %cst_58 = arith.constant dense<0.000000e+00> : vector<8x128xf32>
    %53 = tpu.matmul %52, %3, %cst_58 {dimension_numbers = #tpu.dot_dimension_numbers<[1], [0], [0], [1], [0, 0, 1, 1], [], []>} : vector<8x128xf32>, vector<128x128xf32>, vector<8x128xf32> -> vector<8x128xf32>
    %54 = arith.addf %50, %53 : vector<8x128xf32>
    %c5_59 = arith.constant 5 : index
    %c0_60 = arith.constant 0 : index
    %c0_61 = arith.constant 0 : index
    %55 = vector.load %arg7[%c5_59, %c0_60, %c0_61] : memref<8x8x128xf32, #tpu.memory_space<vmem>>, vector<1x8x128xf32>
    %56 = vector.shape_cast %55 : vector<1x8x128xf32> to vector<8x128xf32>
    %57 = vector.shape_cast %54 : vector<8x128xf32> to vector<1x8x128xf32>
    tpu.vector_store %arg7[%c5_59, %c0_60, %c0_61], %57 {strides = array<i32>} : memref<8x8x128xf32, #tpu.memory_space<vmem>>, vector<1x8x128xf32>,
    %c6 = arith.constant 6 : index
    %c0_62 = arith.constant 0 : index
    %c0_63 = arith.constant 0 : index
    %58 = vector.load %arg7[%c6, %c0_62, %c0_63] : memref<8x8x128xf32, #tpu.memory_space<vmem>>, vector<1x8x128xf32>
    %59 = vector.shape_cast %58 : vector<1x8x128xf32> to vector<8x128xf32>
    %c6_64 = arith.constant 6 : index
    %c0_65 = arith.constant 0 : index
    %c0_66 = arith.constant 0 : index
    %c0_67 = arith.constant 0 : index
    %60 = vector.load %arg3[%c6_64, %c0_65, %c0_66, %c0_67] : memref<8x1x8x128xf32, #tpu.memory_space<vmem>>, vector<1x1x8x128xf32>
    %61 = vector.shape_cast %60 : vector<1x1x8x128xf32> to vector<8x128xf32>
    %cst_68 = arith.constant dense<0.000000e+00> : vector<8x128xf32>
    %62 = tpu.matmul %61, %3, %cst_68 {dimension_numbers = #tpu.dot_dimension_numbers<[1], [0], [0], [1], [0, 0, 1, 1], [], []>} : vector<8x128xf32>, vector<128x128xf32>, vector<8x128xf32> -> vector<8x128xf32>
    %63 = arith.addf %59, %62 : vector<8x128xf32>
    %c6_69 = arith.constant 6 : index
    %c0_70 = arith.constant 0 : index
    %c0_71 = arith.constant 0 : index
    %64 = vector.load %arg7[%c6_69, %c0_70, %c0_71] : memref<8x8x128xf32, #tpu.memory_space<vmem>>, vector<1x8x128xf32>
    %65 = vector.shape_cast %64 : vector<1x8x128xf32> to vector<8x128xf32>
    %66 = vector.shape_cast %63 : vector<8x128xf32> to vector<1x8x128xf32>
    tpu.vector_store %arg7[%c6_69, %c0_70, %c0_71], %66 {strides = array<i32>} : memref<8x8x128xf32, #tpu.memory_space<vmem>>, vector<1x8x128xf32>,
    %c7 = arith.constant 7 : index
    %c0_72 = arith.constant 0 : index
    %c0_73 = arith.constant 0 : index
    %67 = vector.load %arg7[%c7, %c0_72, %c0_73] : memref<8x8x128xf32, #tpu.memory_space<vmem>>, vector<1x8x128xf32>
    %68 = vector.shape_cast %67 : vector<1x8x128xf32> to vector<8x128xf32>
    %c7_74 = arith.constant 7 : index
    %c0_75 = arith.constant 0 : index
    %c0_76 = arith.constant 0 : index
    %c0_77 = arith.constant 0 : index
    %69 = vector.load %arg3[%c7_74, %c0_75, %c0_76, %c0_77] : memref<8x1x8x128xf32, #tpu.memory_space<vmem>>, vector<1x1x8x128xf32>
    %70 = vector.shape_cast %69 : vector<1x1x8x128xf32> to vector<8x128xf32>
    %cst_78 = arith.constant dense<0.000000e+00> : vector<8x128xf32>
    %71 = tpu.matmul %70, %3, %cst_78 {dimension_numbers = #tpu.dot_dimension_numbers<[1], [0], [0], [1], [0, 0, 1, 1], [], []>} : vector<8x128xf32>, vector<128x128xf32>, vector<8x128xf32> -> vector<8x128xf32>
    %72 = arith.addf %68, %71 : vector<8x128xf32>
    %c7_79 = arith.constant 7 : index
    %c0_80 = arith.constant 0 : index
    %c0_81 = arith.constant 0 : index
    %73 = vector.load %arg7[%c7_79, %c0_80, %c0_81] : memref<8x8x128xf32, #tpu.memory_space<vmem>>, vector<1x8x128xf32>
    %74 = vector.shape_cast %73 : vector<1x8x128xf32> to vector<8x128xf32>
    %75 = vector.shape_cast %72 : vector<8x128xf32> to vector<1x8x128xf32>
    tpu.vector_store %arg7[%c7_79, %c0_80, %c0_81], %75 {strides = array<i32>} : memref<8x8x128xf32, #tpu.memory_space<vmem>>, vector<1x8x128xf32>,
    %c0_i32_82 = arith.constant 0 : i32
    %76 = arith.cmpi eq, %arg2, %c0_i32_82 : i32
    %77 = arith.extui %76 : i1 to i32
    %c0_i32_83 = arith.constant 0 : i32
    %78 = arith.cmpi ne, %77, %c0_i32_83 : i32
    scf.if %78 {
      %c0_84 = arith.constant 0 : index
      %c0_85 = arith.constant 0 : index
      %c0_86 = arith.constant 0 : index
      %79 = vector.load %arg7[%c0_84, %c0_85, %c0_86] : memref<8x8x128xf32, #tpu.memory_space<vmem>>, vector<8x8x128xf32>
      %c0_87 = arith.constant 0 : index
      %c0_88 = arith.constant 0 : index
      %80 = vector.load %arg5[%c0_87, %c0_88] : memref<1x128xf32, #tpu.memory_space<vmem>>, vector<1x128xf32>
      %81 = vector.shape_cast %80 : vector<1x128xf32> to vector<1x1x128xf32>
      %82 = vector.broadcast %81 : vector<1x1x128xf32> to vector<8x8x128xf32>
      %83 = arith.addf %79, %82 : vector<8x8x128xf32>
      %c0_89 = arith.constant 0 : index
      %c0_90 = arith.constant 0 : index
      %c0_91 = arith.constant 0 : index
      %84 = vector.load %arg6[%c0_89, %c0_90, %c0_91] : memref<8x8x128xf32, #tpu.memory_space<vmem>>, vector<8x8x128xf32>
      tpu.vector_store %arg6[%c0_89, %c0_90, %c0_91], %83 {strides = array<i32>} : memref<8x8x128xf32, #tpu.memory_space<vmem>>, vector<8x8x128xf32>,
    } else {
    }
    return
  }
  func.func @transform_0(%arg0: i32, %arg1: i32, %arg2: i32) -> (i32, i32, i32, i32) {
    %c0_i32 = arith.constant 0 : i32
    %c0_i32_0 = arith.constant 0 : i32
    %c0_i32_1 = arith.constant 0 : i32
    return %arg0, %c0_i32, %c0_i32_0, %arg2 : i32, i32, i32, i32
  }
  func.func @transform_1(%arg0: i32, %arg1: i32, %arg2: i32) -> (i32, i32) {
    %c0_i32 = arith.constant 0 : i32
    return %arg2, %arg1 : i32, i32
  }
  func.func @transform_2(%arg0: i32, %arg1: i32, %arg2: i32) -> (i32, i32) {
    %c0_i32 = arith.constant 0 : i32
    %c0_i32_0 = arith.constant 0 : i32
    return %c0_i32, %arg1 : i32, i32
  }
  func.func @transform_3(%arg0: i32, %arg1: i32, %arg2: i32) -> (i32, i32, i32) {
    %c0_i32 = arith.constant 0 : i32
    %c0_i32_0 = arith.constant 0 : i32
    return %arg0, %c0_i32, %arg1 : i32, i32, i32
  }
}

</mosaic_0001>

<bundles_post_ra>
// kernel: tpu_custom_call.1
= control target key start
LH: loop header
LB: loop body
LE: loop exit
PB: predicated region body
PF: predicated region fallthrough
CT: control target
= control target key end

     0   :  { %s1270_s0 = inlined_call_operand.hbm [shape: f32[16,2,8,256], index: 0, kind: input, shape index: {}]   ;;  %s1271_s1 = inlined_call_operand.hbm [shape: f32[128,128], index: 1, kind: input, shape index: {}]   ;;  %s1272_s2 = inlined_call_operand.vmem [shape: f32[1,128], index: 2, kind: input, shape index: {}]   ;;  %s1273_s3 = inlined_call_operand.hbm [shape: f32[16,8,128], index: 3, kind: output, shape index: {}]  }
   0x1   :  { %1276 = sst [smem:[#allocation12_spill]] %s1271_s1 }
   0x2   :  { %8 = vsyncpa [#allocation4], 0 }
   0x3   :  { %10 = vsyncpa [#allocation4 + $0x1], 0 }
   0x4   :  { %11 = vsyncpa [#allocation7], 0 }
   0x5   :  { %12 = vsyncpa [#allocation5], 0 }
   0x6   :  { %14 = vsyncpa [#allocation5 + $0x1], 0  ;;  %s939_s12 = smov 0   ;;  %s941_s13 = smov 0  }
   0x7   :  { %s943_s14 = smov 0   ;;  %s945_s15 = smov 0  }
   0x8   :  { %s947_s16 = smov 0   ;;  %s949_s17 = smov 0  }
   0x9 LB: > { %s657_s18 = sadd.s32 4294967295, %s911_s17   ;;  %s658_s19 = sadd.s32 4294967294, %s911_s17   ;;  %s911_s17 = sphi %s949_s17, %s20_s17   ;;  %s907_s16 = sphi %s947_s16, %s1291_s16   ;;  %s903_s15 = sphi %s945_s15, %s1290_s15   ;;  %s899_s14 = sphi %s943_s14, %s1289_s14   ;;  %s895_s13 = sphi %s941_s13, %s1288_s13   ;;  %s891_s12 = sphi %s939_s12, %s1287_s12  }
   0xa   : > { %p61_p0 = scmp.ne.s32.totalorder %s895_s13, %s891_s12  ;;  %p973_p1 = scmp.eq.s32.totalorder %s657_s18, 0 }
   0xb   : > { %p977_p2 = scmp.eq.s32.totalorder %s657_s18, 1  ;;  %p147_p3 = scmp.eq.s32.totalorder %s658_s19, 1 }
   0xc   : > { %p983_p4 = por %p973_p1, %p61_p0  ;;  %p659_p5 = scmp.ge.s32.totalorder %s911_s17, 1 }
   0xd   : > { %p988_p6 = por %p147_p3, %p61_p0  ;;  %p154_p7 = scmp.lt.s32.totalorder %s911_s17, 3 }
   0xe   : > { %s1281_s1 = sld [smem:[#allocation12_spill]]  ;;  %s913_s28 = smov [#allocation6]  }
   0xf   : > { %p996_p8 = pnand %p659_p5, %p154_p7  ;;  %s171_s29 = sshll.u32 %s913_s28, 4  ;;  %s172_s29 = int_to_ptr.vmem [resolvable:$true] %s171_s29 }
  0x10   : > { %p662_p11 = scmp.ge.s32.totalorder %s911_s17, 2  ;;  %s1274_s30 = smov 128  }
  0x11   : > { %p694_p9 = pneg %p996_p8  ;;  %s1275_s4 = smov 8  }
  0x12   : > { %s39_s5 = sadd.s32 1, %s907_s16  ;;  %s48_s6 = sadd.s32 1, %s899_s14 }
  0x13   : > { %p695_p10 = pnand %p694_p9, %p973_p1  ;;  %p41_p12 = scmp.ge.s32.totalorder %s39_s5, 2 }
  0x14   : > { %s169_s26 = sshll.u32 %s1281_s1, 4  ;;  %p55_p13 = scmp.ne.s32.totalorder %s899_s14, %s895_s13  ;;  %s170_s26 = int_to_ptr.hbm [resolvable:$true] %s169_s26 }
  0x15   : > { %697 = dma.hbm_to_vmem [thread:$0]  (!%p695_p10), %s170_s26, 2048, %s172_s29, [#allocation7], %s1274_s30, %s1274_s30, %s1275_s4  }
  0x16   : > { %p56_p0 = scmp.eq.s32.totalorder %s911_s17, 0  ;;  %s1293_s5 = smov (%p41_p12, %s39_s5), 0 }
  0x17   : > { %p1021_p5 = por %p977_p2, %p55_p13  ;;  %s43_s9 = ssub.s32 %s907_s16, %s1293_s5 }
  0x18   : > { %p1015_p3 = por %p56_p0, %p55_p13  ;;  %p707_p7 = scmp.lt.s32.totalorder %s911_s17, 2 }
  0x19   : > { %p46_p9 = scmp.eq.s32.totalorder %s43_s9, 0  ;;  %s191_s10 = sand.u32 1, %s899_s14  }
  0x1a   : > { %s663_s11 = sshll.u32 %s191_s10, 6  ;;  %s684_s19 = sshll.u32 %s907_s16, 8 }
  0x1b   : > { %s1030_s18 = scalar_select %p46_p9, %s899_s14, %s48_s6  }
  0x1c   : > { %s202_s26 = scalar_lea.hbm %s1270_s0, %s684_s19  ;;  %s195_s28 = scalar_lea.vmem [#allocation3], %s663_s11 }
  0x1d   : > { %s205_s29 = sshll.u32 %s195_s28, 4  ;;  %s203_s21 = sshll.u32 %s202_s26, 4  ;;  %s206_s29 = int_to_ptr.vmem [resolvable:$true] %s205_s29  ;;  %s204_s21 = int_to_ptr.hbm [resolvable:$true] %s203_s21 }
  0x1e   : > { %p699_p2 = pnand %p707_p7, %p1015_p3  ;;  %s192_s30 = scalar_lea.sflag [#allocation4], %s191_s10 }
  0x1f   : > { %s916_s4 = smov 512   ;;  %s1285_s1 = smov 8  }
  0x20   : > { %s1286_s9 = smov 128   ;;  %217 = sbr.rel (%p996_p8) target bundleno = 245 (0xf5), region = 32 }
  0x21   : > { %701 = dma.hbm_to_vmem [thread:$0]  (!%p699_p2), %s204_s21, 1024, %s206_s29, %s192_s30, %s916_s4, %s1286_s9, %s1285_s1  }
  0x22   : > { %s1043_s6 = sand.u32 (!%p996_p8), 1, %s895_s13  }
  0x23   : > { %s668_s11 = sshll.u32 (!%p996_p8), %s1043_s6, 6  ;;  %s220_s19 = scalar_lea.sflag (!%p996_p8), [#allocation4], %s1043_s6 }
  0x24   : > { %s1049_s7 = scalar_lea.vmem (!%p996_p8), [#allocation3], %s668_s11 }
  0x25   : > { %878 = dma.done.wait (%p983_p4), %s220_s19, 1024  }
  0x26   : > { %880 = vsyncadd (%p983_p4), %s220_s19, 4294966272 }
  0x27   : > { %882 = dma.done.wait (%p973_p1), [#allocation7], 2048  }
  0x28   : > { %884 = vsyncadd (%p973_p1), [#allocation7], 4294965248  ;;  %v1059_v0 = vld [vmem:[#allocation6 + $0x78] sm:$0xff]  ;;  %v1061_v1 = vld [vmem:[#allocation6 + $0x70] sm:$0xff]  ;;  %s254_s22 = scalar_lea.vmem [#allocation8], %s668_s11  ;;  %s685_s27 = sshll.u32 %s903_s15, 6 }
  0x29   : > { %343 = vmatpush.msra.mxu2 %v1059_v0  ;;  %369 = vmatpush.msra.mxu3 %v1059_v0  ;;  %v1065_v2 = vld [vmem:[#allocation6 + $0x68] sm:$0xff]  ;;  %v1071_v3 = vld [vmem:[#allocation6 + $0x60] sm:$0xff]  ;;  %v1077_v4 = vld [vmem:[#allocation6 + $0x58] sm:$0xff]  ;;  %s539_s10 = scalar_lea.hbm %s1273_s3, %s685_s27  ;;  %s540_s24 = sshll.u32 %s254_s22, 4  ;;  %s541_s24 = int_to_ptr.vmem [resolvable:$true] %s540_s24 }
  0x2a   : > { %291 = vmatpush.msra.mxu0 %v1059_v0  ;;  %317 = vmatpush.msra.mxu1 %v1059_v0  ;;  %v1083_v5 = vld [vmem:[#allocation6 + $0x50] sm:$0xff]  ;;  %v1089_v6 = vld [vmem:[#allocation6 + $0x48] sm:$0xff]  ;;  %v1095_v7 = vld [vmem:[#allocation6 + $0x40] sm:$0xff]  ;;  %s542_s25 = sshll.u32 %s539_s10, 4  ;;  %s527_s15 = scalar_lea.sflag [#allocation5], %s1043_s6  ;;  %s543_s25 = int_to_ptr.hbm [resolvable:$true] %s542_s25 }
  0x2b   : > { %344 = vmatpush.msra.mxu2 %v1061_v1  ;;  %370 = vmatpush.msra.mxu3 %v1061_v1  ;;  %v1101_v8 = vld [vmem:[#allocation6 + $0x38] sm:$0xff]  ;;  %v1107_v9 = vld [vmem:[#allocation6 + $0x30] sm:$0xff]  ;;  %v1113_v10 = vld [vmem:[#allocation6 + $0x28] sm:$0xff]  ;;  %s839_s26 = sshra.s32 %s543_s25, 4  ;;  %s845_s9 = scalar_lea.hbm %s1273_s3, 128  ;;  %s840_s26 = int_to_ptr.hbm [resolvable:$true] %s839_s26 }
  0x2c   : > { %292 = vmatpush.msra.mxu0 %v1061_v1  ;;  %318 = vmatpush.msra.mxu1 %v1061_v1  ;;  %v1119_v11 = vld [vmem:[#allocation6 + $0x20] sm:$0xff]  ;;  %v1125_v12 = vld [vmem:[#allocation6 + $0x18] sm:$0xff]  ;;  %v1131_v13 = vld [vmem:[#allocation6 + $0x10] sm:$0xff]  ;;  %s841_s28 = scalar_lea.hbm %s840_s26, 64  ;;  %p846_p10 = scmp.lt.s32.totalorder %s840_s26, %s1273_s3 }
  0x2d   : > { %345 = vmatpush.msra.mxu2 %v1065_v2  ;;  %371 = vmatpush.msra.mxu3 %v1065_v2  ;;  %v1137_v14 = vld [vmem:[#allocation6 + $0x8] sm:$0xff]  ;;  %v1143_v15 = vld [vmem:[#allocation6] sm:$0xff]  ;;  %v672_v16 = vld [vmem:[%s1049_s7 + $0x10] sm:$0xff]  ;;  %p842_p1 = scmp.ne.s32.totalorder %s840_s26, %s841_s28  ;;  %p847_p12 = scmp.lt.s32.totalorder %s845_s9, %s841_s28 }
  0x2e   : > { %293 = vmatpush.msra.mxu0 %v1065_v2  ;;  %319 = vmatpush.msra.mxu1 %v1065_v2  ;;  %v673_v17 = vld [vmem:[%s1049_s7 + $0x18] sm:$0xff]  ;;  %v290_v18 = vld [vmem:[%s1049_s7] sm:$0xff]  ;;  %v671_v19 = vld [vmem:[%s1049_s7 + $0x8] sm:$0xff] }
  0x2f   : > { %346 = vmatpush.msra.mxu2 %v1071_v3  ;;  %372 = vmatpush.msra.mxu3 %v1071_v3  ;;  %v676_v20 = vld [vmem:[%s1049_s7 + $0x30] sm:$0xff]  ;;  %v677_v21 = vld [vmem:[%s1049_s7 + $0x38] sm:$0xff]  ;;  %v674_v22 = vld [vmem:[%s1049_s7 + $0x20] sm:$0xff]  ;;  %p843_p4 = pnand %p842_p1, %p1021_p5  ;;  %p848_p13 = por %p847_p12, %p846_p10 }
  0x30   : > { %294 = vmatpush.msra.mxu0 %v1071_v3  ;;  %320 = vmatpush.msra.mxu1 %v1071_v3  ;;  %v675_v23 = vld [vmem:[%s1049_s7 + $0x28] sm:$0xff]  ;;  %v764_v24 = vld [vmem:[%s1272_s2] ss:$0 sm:$0xff] }
  0x31   : > { %347 = vmatpush.msra.mxu2 %v1077_v4  ;;  %373 = vmatpush.msra.mxu3 %v1077_v4  ;;  %p844_p8 = pneg %p843_p4 }
  0x32   : > { %295 = vmatpush.msra.mxu0 %v1077_v4  ;;  %321 = vmatpush.msra.mxu1 %v1077_v4 }
  0x33   : > { %348 = vmatpush.msra.mxu2 %v1083_v5  ;;  %374 = vmatpush.msra.mxu3 %v1083_v5  ;;  %p849_p0 = pnand %p848_p13, %p844_p8 }
  0x34   : > { %296 = vmatpush.msra.mxu0 %v1083_v5  ;;  %322 = vmatpush.msra.mxu1 %v1083_v5 }
  0x35   : > { %349 = vmatpush.msra.mxu2 %v1089_v6  ;;  %375 = vmatpush.msra.mxu3 %v1089_v6 }
  0x36   : > { %297 = vmatpush.msra.mxu0 %v1089_v6  ;;  %323 = vmatpush.msra.mxu1 %v1089_v6 }
  0x37   : > { %350 = vmatpush.msra.mxu2 %v1095_v7  ;;  %376 = vmatpush.msra.mxu3 %v1095_v7 }
  0x38   : > { %298 = vmatpush.msra.mxu0 %v1095_v7  ;;  %324 = vmatpush.msra.mxu1 %v1095_v7 }
  0x39   : > { %351 = vmatpush.msra.mxu2 %v1101_v8  ;;  %377 = vmatpush.msra.mxu3 %v1101_v8 }
  0x3a   : > { %299 = vmatpush.msra.mxu0 %v1101_v8  ;;  %325 = vmatpush.msra.mxu1 %v1101_v8 }
  0x3b   : > { %352 = vmatpush.msra.mxu2 %v1107_v9  ;;  %378 = vmatpush.msra.mxu3 %v1107_v9 }
  0x3c   : > { %300 = vmatpush.msra.mxu0 %v1107_v9  ;;  %326 = vmatpush.msra.mxu1 %v1107_v9 }
  0x3d   : > { %353 = vmatpush.msra.mxu2 %v1113_v10  ;;  %379 = vmatpush.msra.mxu3 %v1113_v10 }
  0x3e   : > { %301 = vmatpush.msra.mxu0 %v1113_v10  ;;  %327 = vmatpush.msra.mxu1 %v1113_v10 }
  0x3f   : > { %354 = vmatpush.msra.mxu2 %v1119_v11  ;;  %380 = vmatpush.msra.mxu3 %v1119_v11 }
  0x40   : > { %302 = vmatpush.msra.mxu0 %v1119_v11  ;;  %328 = vmatpush.msra.mxu1 %v1119_v11 }
  0x41   : > { %355 = vmatpush.msra.mxu2 %v1125_v12  ;;  %381 = vmatpush.msra.mxu3 %v1125_v12 }
  0x42   : > { %303 = vmatpush.msra.mxu0 %v1125_v12  ;;  %329 = vmatpush.msra.mxu1 %v1125_v12 }
  0x43   : > { %356 = vmatpush.msra.mxu2 %v1131_v13  ;;  %382 = vmatpush.msra.mxu3 %v1131_v13 }
  0x44   : > { %304 = vmatpush.msra.mxu0 %v1131_v13  ;;  %330 = vmatpush.msra.mxu1 %v1131_v13 }
  0x45   : > { %357 = vmatpush.msra.mxu2 %v1137_v14  ;;  %383 = vmatpush.msra.mxu3 %v1137_v14 }
  0x46   : > { %305 = vmatpush.msra.mxu0 %v1137_v14  ;;  %331 = vmatpush.msra.mxu1 %v1137_v14 }
  0x47   : > { %358 = vmatpush.msra.mxu2 %v1143_v15  ;;  %384 = vmatpush.msra.mxu3 %v1143_v15 }
  0x48   : > { %306 = vmatpush.msra.mxu0 %v1143_v15  ;;  %332 = vmatpush.msra.mxu1 %v1143_v15 }
  0x49   : > { %447 = vmatpush.msrb.mxu2 %v1059_v0  ;;  %473 = vmatpush.msrb.mxu3 %v1059_v0 }
  0x4a   : > { %395 = vmatpush.msrb.mxu0 %v1059_v0  ;;  %421 = vmatpush.msrb.mxu1 %v1059_v0 }
  0x4b   : > { %448 = vmatpush.msrb.mxu2 %v1061_v1  ;;  %474 = vmatpush.msrb.mxu3 %v1061_v1 }
  0x4c   : > { %396 = vmatpush.msrb.mxu0 %v1061_v1  ;;  %422 = vmatpush.msrb.mxu1 %v1061_v1 }
  0x4d   : > { %449 = vmatpush.msrb.mxu2 %v1065_v2  ;;  %475 = vmatpush.msrb.mxu3 %v1065_v2 }
  0x4e   : > { %397 = vmatpush.msrb.mxu0 %v1065_v2  ;;  %423 = vmatpush.msrb.mxu1 %v1065_v2 }
  0x4f   : > { %450 = vmatpush.msrb.mxu2 %v1071_v3  ;;  %476 = vmatpush.msrb.mxu3 %v1071_v3 }
  0x50   : > { %398 = vmatpush.msrb.mxu0 %v1071_v3  ;;  %424 = vmatpush.msrb.mxu1 %v1071_v3 }
  0x51   : > { %451 = vmatpush.msrb.mxu2 %v1077_v4  ;;  %477 = vmatpush.msrb.mxu3 %v1077_v4 }
  0x52   : > { %399 = vmatpush.msrb.mxu0 %v1077_v4  ;;  %425 = vmatpush.msrb.mxu1 %v1077_v4 }
  0x53   : > { %452 = vmatpush.msrb.mxu2 %v1083_v5  ;;  %478 = vmatpush.msrb.mxu3 %v1083_v5 }
  0x54   : > { %400 = vmatpush.msrb.mxu0 %v1083_v5  ;;  %426 = vmatpush.msrb.mxu1 %v1083_v5 }
  0x55   : > { %453 = vmatpush.msrb.mxu2 %v1089_v6  ;;  %479 = vmatpush.msrb.mxu3 %v1089_v6 }
  0x56   : > { %401 = vmatpush.msrb.mxu0 %v1089_v6  ;;  %427 = vmatpush.msrb.mxu1 %v1089_v6 }
  0x57   : > { %454 = vmatpush.msrb.mxu2 %v1095_v7  ;;  %480 = vmatpush.msrb.mxu3 %v1095_v7 }
  0x58   : > { %402 = vmatpush.msrb.mxu0 %v1095_v7  ;;  %428 = vmatpush.msrb.mxu1 %v1095_v7 }
  0x59   : > { %455 = vmatpush.msrb.mxu2 %v1101_v8  ;;  %481 = vmatpush.msrb.mxu3 %v1101_v8 }
  0x5a   : > { %403 = vmatpush.msrb.mxu0 %v1101_v8  ;;  %429 = vmatpush.msrb.mxu1 %v1101_v8 }
  0x5b   : > { %456 = vmatpush.msrb.mxu2 %v1107_v9  ;;  %482 = vmatpush.msrb.mxu3 %v1107_v9 }
  0x5c   : > { %359 = vmatmul.f32.vlgmr.msra.gmra.mxu2 %v672_v16  ;;  %385 = vmatmul.f32.vlgmr.msra.gmra.mxu3 %v673_v17 }
  0x5d   : > { %457 = vmatpush.msrb.mxu2 %v1113_v10  ;;  %483 = vmatpush.msrb.mxu3 %v1113_v10 }
  0x5e   : > { %404 = vmatpush.msrb.mxu0 %v1107_v9  ;;  %430 = vmatpush.msrb.mxu1 %v1107_v9 }
  0x5f   : > { %458 = vmatpush.msrb.mxu2 %v1119_v11  ;;  %484 = vmatpush.msrb.mxu3 %v1119_v11 }
  0x60   : > { %405 = vmatpush.msrb.mxu0 %v1113_v10  ;;  %431 = vmatpush.msrb.mxu1 %v1113_v10 }
  0x61   : > { %459 = vmatpush.msrb.mxu2 %v1125_v12  ;;  %485 = vmatpush.msrb.mxu3 %v1125_v12 }
  0x62   : > { %406 = vmatpush.msrb.mxu0 %v1119_v11  ;;  %432 = vmatpush.msrb.mxu1 %v1119_v11 }
  0x63   : > { %460 = vmatpush.msrb.mxu2 %v1131_v13  ;;  %486 = vmatpush.msrb.mxu3 %v1131_v13 }
  0x64   : > { %307 = vmatmul.f32.vlgmr.msra.gmra.mxu0 %v290_v18  ;;  %333 = vmatmul.f32.vlgmr.msra.gmra.mxu1 %v671_v19 }
  0x65   : > { %461 = vmatpush.msrb.mxu2 %v1137_v14  ;;  %487 = vmatpush.msrb.mxu3 %v1137_v14 }
  0x66   : > { %407 = vmatpush.msrb.mxu0 %v1125_v12  ;;  %433 = vmatpush.msrb.mxu1 %v1125_v12 }
  0x67   : > { %462 = vmatpush.msrb.mxu2 %v1143_v15  ;;  %488 = vmatpush.msrb.mxu3 %v1143_v15 }
  0x68   : > { %463 = vmatmul.f32.vlgmr.msrb.gmra.mxu2 %v676_v20  ;;  %489 = vmatmul.f32.vlgmr.msrb.gmra.mxu3 %v677_v21 }
  0x69   : > { %408 = vmatpush.msrb.mxu0 %v1131_v13  ;;  %434 = vmatpush.msrb.mxu1 %v1131_v13 }
  0x6b   : > { %409 = vmatpush.msrb.mxu0 %v1137_v14  ;;  %435 = vmatpush.msrb.mxu1 %v1137_v14 }
  0x6d   : > { %410 = vmatpush.msrb.mxu0 %v1143_v15  ;;  %436 = vmatpush.msrb.mxu1 %v1143_v15 }
  0x6e   : > { %411 = vmatmul.f32.vlgmr.msrb.gmra.mxu0 %v674_v22  ;;  %437 = vmatmul.f32.vlgmr.msrb.gmra.mxu1 %v675_v23 }
  0xdf   : > { %v360_v25 = vpop.f32.mrf.mxu2  ;;  %v386_v26 = vpop.f32.mrf.mxu3 }
  0xe0   : > { %v512_v27 = vadd.f32 %v764_v24, %v360_v25  ;;  %v513_v28 = vadd.f32 %v764_v24, %v386_v26 }
  0xe1   : > { %v308_v29 = vpop.f32.mrf.mxu0  ;;  %v334_v30 = vpop.f32.mrf.mxu1 }
  0xe2   : > { %v510_v31 = vadd.f32 %v764_v24, %v308_v29  ;;  %v511_v32 = vadd.f32 %v764_v24, %v334_v30  ;;  %520 = vst [vmem:[%s254_s22 + $0x10] sm:$0xff] %v512_v27 }
  0xe3   : > { %521 = vst [vmem:[%s254_s22 + $0x18] sm:$0xff] %v513_v28 }
  0xe4   : > { %518 = vst [vmem:[%s254_s22] sm:$0xff] %v510_v31 }
  0xe5   : > { %519 = vst [vmem:[%s254_s22 + $0x8] sm:$0xff] %v511_v32 }
  0xeb   : > { %v412_v33 = vpop.f32.mrf.mxu0  ;;  %v438_v34 = vpop.f32.mrf.mxu1 }
  0xec   : > { %v514_v35 = vadd.f32 %v764_v24, %v412_v33  ;;  %v515_v36 = vadd.f32 %v764_v24, %v438_v34  ;;  %v464_v37 = vpop.f32.mrf.mxu2  ;;  %v490_v38 = vpop.f32.mrf.mxu3 }
  0xed   : > { %v516_v39 = vadd.f32 %v764_v24, %v464_v37  ;;  %v517_v40 = vadd.f32 %v764_v24, %v490_v38 }
  0xee   : > { %522 = vst [vmem:[%s254_s22 + $0x20] sm:$0xff] %v514_v35 }
  0xef   : > { %523 = vst [vmem:[%s254_s22 + $0x28] sm:$0xff] %v515_v36 }
  0xf0   : > { %524 = vst [vmem:[%s254_s22 + $0x30] sm:$0xff] %v516_v39 }
  0xf1   : > { %525 = vst [vmem:[%s254_s22 + $0x38] sm:$0xff] %v517_v40 }
  0xf2   : > { %852 = shalt.err (!%p849_p0)
}
  0xf3   : > { %s917_s6 = smov 128   ;;  %s918_s7 = smov 8  }
  0xf4   : > { %692 = dma.vmem_to_hbm [thread:$0]  (%p1021_p5), %s541_s24, 1024, %s543_s25, %s527_s15, %s917_s6, %s917_s6, %s918_s7  }
  0xf5 PF: > { %s557_s1 = sand.u32 1, %s891_s12   ;;  %p703_p3 = pnand %p662_p11, %p988_p6 }
  0xf6   : > { %s558_s20 = scalar_lea.sflag [#allocation5], %s557_s1 }
  0xf7   : > { %p704_p7 = pneg %p703_p3 }
  0xf9   : > { %886 = dma.done.wait (%p704_p7), %s558_s20, 1024  }
  0xfa   : > { %888 = vsyncadd (%p704_p7), %s558_s20, 4294966272  ;;  %s20_s17 = sadd.s32 1, %s911_s17   ;;  %s1287_s12 = smov %s895_s13 }
  0xfb   : > { %p17_p9 = scmp.ge.s32.totalorder %s20_s17, 4   ;;  %s1288_s13 = smov %s899_s14 }
  0xfc   : > { %s1289_s14 = smov %s1030_s18  ;;  %s1290_s15 = smov %s907_s16 }
  0xfd   : > { %s1291_s16 = smov %s1293_s5  ;;  %19 = sbr.rel (!%p17_p9) target bundleno = 9 (0x9), region = 107 }
 0x102   :  { %564 = vsyncpa [#allocation4], 1 }
 0x103   :  { %566 = vsyncpa [#allocation4 + $0x1], 1 }
 0x104   :  { %567 = vsyncpa [#allocation7], 1 }
 0x105   :  { %568 = vsyncpa [#allocation5], 1 }
 0x106   :  { %570 = vsyncpa [#allocation5 + $0x1], 1 }

</bundles_post_ra>
